<compile_context>
chip_gen: v6e
topology: v6e:2x2x1
jax: 0.10.0
libtpu: 0.0.40
codegen_flags: <defaults>
</compile_context>

<pallas_src>
import jax
import jax.numpy as jnp
from jax.experimental import pallas as pl
from jax.experimental.pallas import tpu as pltpu


_LANES = 128            # vreg lane width: last block dim must be a multiple of this
_SUBLANES = 8           # vreg sublane count: second-minor block dim multiple
_MAX_COLS = 1024        # widest lane-dense slab we bother forming
_TARGET_TILE_BYTES = 2 * 1024 * 1024   # ~2 MiB/tile -> 4x tiles (double-buffered
                                       # in+out) = 8 MiB VMEM, safe on all gens


def _identity_kernel(x_ref, o_ref):
    # Pure passthrough: copy the current VMEM tile to the (aliased) output tile.
    o_ref[...] = x_ref[...]


def identity_noise(x):
    """Identity-mapping noise layer: returns the input unchanged."""
    orig_shape = x.shape
    total = x.size

    if total % _LANES != 0:
        # Ragged fallback: a single block equal to the full flattened array
        # (block_shape == array shape is always legal regardless of (8,128)).
        flat = x.reshape(1, total)
        block_shape = flat.shape
        grid = (1,)
    else:
        # Lane-dense 2D slab: last dim a multiple of 128 (up to 1024) so every
        # store is a full-width vst rather than a masked partial store.
        cols = _LANES
        while cols * 2 <= _MAX_COLS and total % (cols * 2) == 0:
            cols *= 2
        rows = total // cols
        flat = x.reshape(rows, cols)

        bytes_per_row = cols * flat.dtype.itemsize
        target_rows = max(_SUBLANES, _TARGET_TILE_BYTES // bytes_per_row)
        target_rows = (target_rows // _SUBLANES) * _SUBLANES
        # Full extent if the slab is small; otherwise a multiple-of-8 row tile
        # (partial trailing block is handled by Pallas).
        block_rows = rows if rows <= target_rows else target_rows
        block_shape = (block_rows, cols)
        grid = (pl.cdiv(rows, block_rows),)

    out_flat = pl.pallas_call(
        _identity_kernel,
        out_shape=jax.ShapeDtypeStruct(flat.shape, flat.dtype),
        grid=grid,
        in_specs=[pl.BlockSpec(block_shape, lambda i: (i, 0))],
        out_specs=pl.BlockSpec(block_shape, lambda i: (i, 0)),
        # Identity: let the output alias the input buffer so no second HBM
        # allocation / round trip is required when the input is consumed.
        input_output_aliases={0: 0},
        compiler_params=pltpu.CompilerParams(
            dimension_semantics=("parallel",),
        ),
    )(flat)

    return out_flat.reshape(orig_shape)


if __name__ == "__main__":
    key = jax.random.PRNGKey(0)
    # Small "audio-like" 4D input (batch, channels, H, W) consistent with the
    # framework's noise-layer interface.
    x = jax.random.normal(key, (2, 4, 16, 16), dtype=jnp.float32)

    y = identity_noise(x)
    jax.block_until_ready(y)

    assert y.shape == x.shape and y.dtype == x.dtype
    assert bool(jnp.all(y == x))
    print("KERNEL_OK")
</pallas_src>

<mosaic_0001>
module attributes {stable_mosaic.version = 11 : i64} {
  func.func @_identity_kernel(%arg0: i32, %arg1: memref<2x1024xf32, #tpu.memory_space<vmem>>, %arg2: memref<2x1024xf32, #tpu.memory_space<vmem>>) attributes {dimension_semantics = [#tpu.dimension_semantics<parallel>], iteration_bounds = array<i64: 1>, scalar_prefetch = 0 : i64, scratch_operands = 0 : i64, tpu.core_type = #tpu.core_type<tc>, window_params = [{transform_indices = @transform_0, window_bounds = array<i64: 2, 1024>}, {transform_indices = @transform_1, window_bounds = array<i64: 2, 1024>}]} {
    %c0 = arith.constant 0 : index
    %c0_0 = arith.constant 0 : index
    %0 = vector.load %arg1[%c0, %c0_0] : memref<2x1024xf32, #tpu.memory_space<vmem>>, vector<2x1024xf32>
    %c0_1 = arith.constant 0 : index
    %c0_2 = arith.constant 0 : index
    %1 = vector.load %arg2[%c0_1, %c0_2] : memref<2x1024xf32, #tpu.memory_space<vmem>>, vector<2x1024xf32>
    tpu.vector_store %arg2[%c0_1, %c0_2], %0 {strides = array<i32>} : memref<2x1024xf32, #tpu.memory_space<vmem>>, vector<2x1024xf32>,
    return
  }
  func.func @transform_0(%arg0: i32) -> (i32, i32) {
    %c0_i32 = arith.constant 0 : i32
    %c0_i32_0 = arith.constant 0 : i32
    return %arg0, %c0_i32 : i32, i32
  }
  func.func @transform_1(%arg0: i32) -> (i32, i32) {
    %c0_i32 = arith.constant 0 : i32
    %c0_i32_0 = arith.constant 0 : i32
    return %arg0, %c0_i32 : i32, i32
  }
}

</mosaic_0001>

<bundles_post_ra>
// kernel: tpu_custom_call.1
= control target key start
LH: loop header
LB: loop body
LE: loop exit
PB: predicated region body
PF: predicated region fallthrough
CT: control target
= control target key end

     0   :  { %6 = vsyncpa [#allocation3], 0  ;;  %s104_s0 = inlined_call_operand.hbm [shape: f32[2,1024], index: 0, kind: input, shape index: {}, may-alias: {0,1}]   ;;  %s105_s1 = inlined_call_operand.hbm [shape: f32[2,1024], index: 1, kind: output, shape index: {}, may-alias: {0,1}]  }
   0x1   :  { %7 = vsyncpa [#allocation4], 0  ;;  %s86_s6 = smov [#allocation2]  }
   0x2   :  { %s14_s7 = sshll.u32 %s86_s6, 4  ;;  %s15_s7 = int_to_ptr.vmem [resolvable:$true] %s14_s7 }
   0x3   :  { %s50_s8 = scalar_lea.vmem %s15_s7, 256  ;;  %p55_p1 = scmp.lt.s32.totalorder %s15_s7, %s15_s7 }
   0x4   :  { %p51_p0 = scmp.ne.s32.totalorder %s15_s7, %s50_s8  ;;  %p56_p2 = scmp.lt.s32.totalorder %s50_s8, %s50_s8 }
   0x6   :  { %p57_p3 = por %p56_p2, %p55_p1 }
   0x8   :  { %p58_p4 = pnand %p57_p3, %p51_p0 }
   0xa   :  { %61 = shalt.err (!%p58_p4)
}
   0xb   :  { %17 = dma.hbm_to_vmem [thread:$0]  %s104_s0, 256, %s15_s7, [#allocation3]  }
   0xc   :  { %82 = dma.done.wait [#allocation3], 256  }
   0xd   :  { %83 = vsyncadd [#allocation3], 4294967040  ;;  %s87_s11 = smov [#allocation5]   ;;  %v21_v0 = vld [vmem:[#allocation2] sm:$0xff]  ;;  %v22_v1 = vld [vmem:[#allocation2 + $0x8] sm:$0xff] }
   0xe   :  { %s31_s12 = sshll.u32 %s87_s11, 4  ;;  %23 = vst [vmem:[#allocation5] sm:$0xff] %v21_v0  ;;  %24 = vst [vmem:[#allocation5 + $0x8] sm:$0xff] %v22_v1  ;;  %s32_s12 = int_to_ptr.vmem [resolvable:$true] %s31_s12 }
   0xf   :  { %s62_s13 = scalar_lea.vmem %s32_s12, 256  ;;  %p67_p6 = scmp.lt.s32.totalorder %s32_s12, %s32_s12 }
  0x10   :  { %p63_p5 = scmp.ne.s32.totalorder %s32_s12, %s62_s13  ;;  %p68_p7 = scmp.lt.s32.totalorder %s62_s13, %s62_s13 }
  0x12   :  { %p69_p8 = por %p68_p7, %p67_p6 }
  0x14   :  { %p70_p9 = pnand %p69_p8, %p63_p5 }
  0x16   :  { %73 = shalt.err (!%p70_p9)
}
  0x17   :  { %34 = dma.vmem_to_hbm [thread:$0]  %s32_s12, 256, %s105_s1, [#allocation4]  }
  0x18   :  { %84 = dma.done.wait [#allocation4], 256  }
  0x19   :  { %85 = vsyncadd [#allocation4], 4294967040 }
  0x1a   :  { %38 = vsyncpa [#allocation3], 1 }
  0x1b   :  { %39 = vsyncpa [#allocation4], 1 }

</bundles_post_ra>
